<compile_context>
chip_gen: v7x
topology: tpu7x:2x2x1
jax: 0.10.0
libtpu: 0.0.40
codegen_flags: <defaults>
</compile_context>

<pallas_src>
import jax
import jax.numpy as jnp
from jax.experimental import pallas as pl
from jax.experimental.pallas import tpu as pltpu

_LANE = 128
_MAX_COL_BLOCK = 16384  # lane-axis tile cap (always a multiple of 128)


def _estbn_kernel(x_ref, scale_ref, shift_ref, o_ref):
    # x_ref:     (row_block, col_block) tile of the 2-D view of x
    # scale_ref: (row_block, 1) or (1, col_block) f32  (broadcasts)
    # shift_ref: same shape as scale_ref
    x = x_ref[...].astype(jnp.float32)
    o_ref[...] = (x * scale_ref[...] + shift_ref[...]).astype(o_ref.dtype)


def _ceil_to(v, m):
    return -(-v // m) * m


def _default_vmem_limit_bytes():
    """VMEM limit derived from the actual chip; safe fallback = v7x 64 MiB/TC."""
    cap = None
    try:
        cap = getattr(pltpu.get_tpu_info(), "vmem_capacity_bytes", None)
    except Exception:  # query unavailable (e.g. interpret mode)
        cap = None
    if not cap:
        cap = 64 * 1024 * 1024
    # ~48 MiB on v7x (64 MiB physical per TC), 96 MiB on v5e/v6e (128 MiB).
    return min((cap * 3) // 4, 96 * 1024 * 1024)


def _plan_blocks(rows, cols, itemsize, budget_bytes, *, param_on_rows):
    """Pick (row_block, col_block) so the live VMEM fits `budget_bytes`.

    Live VMEM = x in + out tiles (each double-buffered) PLUS the lane/sublane
    padded scale/shift blocks (2 params x 2 buffers) — the padded param
    buffers are counted explicitly (perf-review item #1).
    """
    sub = max(8, 32 // itemsize)  # min sublane multiple: 8 f32, 16 bf16, 32 i8

    # Lane axis: full extent if small enough, else a 128-multiple cap
    # (Pallas masks the tail tile) — never a huge non-128-aligned block.
    col_block = cols if cols <= _MAX_COL_BLOCK else _MAX_COL_BLOCK

    def live_bytes(rb, cb):
        rb_pad = _ceil_to(max(rb, 1), sub)
        cb_pad = _ceil_to(max(cb, 1), _LANE)
        x_bytes = 4 * rb_pad * cb_pad * itemsize            # 2 in + 2 out buffers
        if param_on_rows:                                    # (rb, 1) f32, lane-padded
            p_bytes = 4 * _ceil_to(max(rb, 1), 8) * _LANE * 4
        else:                                                # (1, cb) f32, sublane-padded
            p_bytes = 4 * 8 * cb_pad * 4
        return x_bytes + p_bytes

    # Sublane axis: largest legal row block (multiple of `sub`, or full rows).
    row_block = rows
    if rows > sub and live_bytes(row_block, col_block) > budget_bytes:
        rb = (rows // sub) * sub
        while rb > sub and live_bytes(rb, col_block) > budget_bytes:
            rb = max(sub, ((rb // 2) // sub) * sub)
        row_block = rb

    # If even the minimal row block overshoots, shrink the lane tile.
    while live_bytes(row_block, col_block) > budget_bytes and col_block > _LANE:
        col_block = max(_LANE, ((col_block // 2) // _LANE) * _LANE)

    # Pipelining / megacore: aim for >= 4 grid steps when the tensor is big
    # enough to split, so DMA-in / compute / DMA-out overlap and v7x can
    # shard the parallel axes across both TensorCores.
    def steps(rb, cb):
        return pl.cdiv(rows, rb) * pl.cdiv(cols, cb)

    while steps(row_block, col_block) < 4:
        if rows >= 2 * sub and row_block > sub:
            row_block = max(sub, ((row_block // 2) // sub) * sub)
        elif cols >= 2 * _LANE and col_block > _LANE:
            col_block = max(_LANE, ((col_block // 2) // _LANE) * _LANE)
        else:
            break  # too small to split — single block is fine

    return row_block, col_block


def estbn_forward(x_nchw, weight, bias, running_mean, running_var,
                  eps: float = 1e-7, out_dtype=None,
                  vmem_budget_bytes: int | None = None):
    """EstBN forward. x_nchw: (N, C, H, W). Returns NCHW output (same dtype
    as x unless out_dtype is given; bf16 I/O halves HBM traffic)."""
    assert x_nchw.ndim == 4, "EstBN expects NCHW input"
    n, c, h, w = x_nchw.shape
    hw = h * w
    out_dtype = x_nchw.dtype if out_dtype is None else jnp.dtype(out_dtype)

    # Fold the four per-channel params into one scale/shift pair (plain JAX).
    scale = (weight.astype(jnp.float32)
             * jax.lax.rsqrt(running_var.astype(jnp.float32) + jnp.float32(eps)))
    shift = bias.astype(jnp.float32) - running_mean.astype(jnp.float32) * scale

    # VMEM limit / block budget.
    if vmem_budget_bytes is None:
        vmem_limit = _default_vmem_limit_bytes()
        vmem_budget_bytes = (vmem_limit * 85) // 100
    else:
        vmem_limit = min(max(2 * vmem_budget_bytes, 32 * 1024 * 1024),
                         96 * 1024 * 1024)

    itemsize = x_nchw.dtype.itemsize

    if hw >= _LANE and hw % _LANE == 0:
        # ---- Path A: (N*C, H*W) view; spatial axis lane-dense. -------------
        rows, cols = n * c, hw
        x2d = x_nchw.reshape(rows, cols)          # free view of contiguous NCHW
        # Per-row params (N*C*4 B each in HBM — negligible); their padded VMEM
        # footprint is accounted for in _plan_blocks.
        scale_arr = jnp.tile(scale, n).reshape(rows, 1)
        shift_arr = jnp.tile(shift, n).reshape(rows, 1)
        row_block, col_block = _plan_blocks(rows, cols, itemsize,
                                            vmem_budget_bytes, param_on_rows=True)
        # Rows outer -> the (row_block, 1) param blocks are DMA'd once per row
        # tile instead of once per grid step.
        grid = (pl.cdiv(rows, row_block), pl.cdiv(cols, col_block))
        x_spec = pl.BlockSpec((row_block, col_block), lambda i, j: (i, j))
        p_spec = pl.BlockSpec((row_block, 1), lambda i, j: (i, 0))
    else:
        # ---- Path B: (N, C*H*W) view; lane-dense even for small/odd H*W. ---
        rows, cols = n, c * hw
        x2d = x_nchw.reshape(rows, cols)
        scale_arr = jnp.repeat(scale, hw).reshape(1, cols)
        shift_arr = jnp.repeat(shift, hw).reshape(1, cols)
        row_block, col_block = _plan_blocks(rows, cols, itemsize,
                                            vmem_budget_bytes, param_on_rows=False)
        # Column axis OUTER so the (1, col_block) param blocks are fetched once
        # per column tile, never re-DMA'd on the inner row steps.
        grid = (pl.cdiv(cols, col_block), pl.cdiv(rows, row_block))
        x_spec = pl.BlockSpec((row_block, col_block), lambda j, i: (i, j))
        p_spec = pl.BlockSpec((1, col_block), lambda j, i: (0, j))

    cost = pl.CostEstimate(
        flops=2 * rows * cols,
        transcendentals=0,
        bytes_accessed=rows * cols * (itemsize + out_dtype.itemsize)
                       + 2 * (scale_arr.size * 4),
    )

    out2d = pl.pallas_call(
        _estbn_kernel,
        out_shape=jax.ShapeDtypeStruct((rows, cols), out_dtype),
        grid_spec=pltpu.PrefetchScalarGridSpec(
            num_scalar_prefetch=0,
            grid=grid,
            in_specs=[x_spec, p_spec, p_spec],
            out_specs=x_spec,
        ),
        compiler_params=pltpu.CompilerParams(
            dimension_semantics=("parallel", "parallel"),
            vmem_limit_bytes=int(vmem_limit),
        ),
        cost_estimate=cost,
    )(x2d, scale_arr, shift_arr)

    # Free view back to NCHW.
    return out2d.reshape(n, c, h, w)


# TODO(synk): training-mode running-stat update is a no-op with the module's
# default estbn_moving_speed == 0, so only the inference forward is kernelized.


if __name__ == "__main__":
    def ref_estbn(x, weight, bias, mean, var, eps):
        cc = x.shape[1]
        out = (x - mean.reshape(1, cc, 1, 1)) / jnp.sqrt(
            var.reshape(1, cc, 1, 1) + eps)
        return weight.reshape(1, cc, 1, 1) * out + bias.reshape(1, cc, 1, 1)

    def make_inputs(key, n, c, h, w, dtype=jnp.float32):
        kx, kw, kb, km, kv = jax.random.split(key, 5)
        x = jax.random.normal(kx, (n, c, h, w), dtype=jnp.float32).astype(dtype)
        weight = jnp.ones((c,), jnp.float32) + 0.1 * jax.random.normal(kw, (c,))
        bias = 0.1 * jax.random.normal(kb, (c,))
        mean = 0.1 * jax.random.normal(km, (c,))
        var = jnp.ones((c,), jnp.float32) + 0.05 * jax.random.uniform(kv, (c,))
        return x, weight, bias, mean, var

    eps = 1e-7  # module default (intentionally not the usual BN 1e-5)

    # 1) Primary small shape from the module spec (path A, H*W % 128 == 0).
    x, w_, b_, m_, v_ = make_inputs(jax.random.PRNGKey(0), 2, 4, 16, 16)
    out = jax.block_until_ready(estbn_forward(x, w_, b_, m_, v_, eps=eps))
    ref = ref_estbn(x, w_, b_, m_, v_, eps)
    assert out.shape == x.shape
    assert jnp.allclose(out, ref, atol=1e-5, rtol=1e-5)

    # 2) Odd spatial size -> lane-dense (N, C*H*W) path B with sublane padding.
    x, w_, b_, m_, v_ = make_inputs(jax.random.PRNGKey(1), 2, 5, 12, 11)
    out = jax.block_until_ready(estbn_forward(x, w_, b_, m_, v_, eps=eps))
    ref = ref_estbn(x, w_, b_, m_, v_, eps)
    assert jnp.allclose(out, ref, atol=1e-5, rtol=1e-5)

    # 3) Forced multi-block tiling (tiny budget) with partial tail tiles.
    x, w_, b_, m_, v_ = make_inputs(jax.random.PRNGKey(2), 3, 8, 20, 20)
    out = jax.block_until_ready(
        estbn_forward(x, w_, b_, m_, v_, eps=eps, vmem_budget_bytes=256 * 1024))
    ref = ref_estbn(x, w_, b_, m_, v_, eps)
    assert jnp.allclose(out, ref, atol=1e-5, rtol=1e-5)

    # 4) bf16 I/O path (halves HBM bytes on this memory-bound op).
    x, w_, b_, m_, v_ = make_inputs(jax.random.PRNGKey(3), 2, 8, 16, 16,
                                    dtype=jnp.bfloat16)
    out = jax.block_until_ready(estbn_forward(x, w_, b_, m_, v_, eps=eps))
    ref = ref_estbn(x.astype(jnp.float32), w_, b_, m_, v_, eps)
    assert jnp.allclose(out.astype(jnp.float32), ref, atol=5e-2, rtol=5e-2)

    print("KERNEL_OK")
</pallas_src>

<mosaic_0001>
module attributes {stable_mosaic.version = 11 : i64} {
  func.func @_estbn_kernel(%arg0: i32, %arg1: i32, %arg2: memref<8x128xf32, #tpu.memory_space<vmem>>, %arg3: memref<8x1xf32, #tpu.memory_space<vmem>>, %arg4: memref<8x1xf32, #tpu.memory_space<vmem>>, %arg5: memref<8x128xf32, #tpu.memory_space<vmem>>) attributes {dimension_semantics = [#tpu.dimension_semantics<parallel>, #tpu.dimension_semantics<parallel>], iteration_bounds = array<i64: 1, 2>, scalar_prefetch = 0 : i64, scratch_operands = 0 : i64, tpu.core_type = #tpu.core_type<tc>, window_params = [{transform_indices = @transform_0, window_bounds = array<i64: 8, 128>}, {transform_indices = @transform_1, window_bounds = array<i64: 8, 1>}, {transform_indices = @transform_2, window_bounds = array<i64: 8, 1>}, {transform_indices = @transform_3, window_bounds = array<i64: 8, 128>}]} {
    %c0 = arith.constant 0 : index
    %c0_0 = arith.constant 0 : index
    %0 = vector.load %arg2[%c0, %c0_0] : memref<8x128xf32, #tpu.memory_space<vmem>>, vector<8x128xf32>
    %c0_1 = arith.constant 0 : index
    %c0_2 = arith.constant 0 : index
    %1 = vector.load %arg3[%c0_1, %c0_2] : memref<8x1xf32, #tpu.memory_space<vmem>>, vector<8x1xf32>
    %2 = vector.broadcast %1 : vector<8x1xf32> to vector<8x128xf32>
    %3 = arith.mulf %0, %2 : vector<8x128xf32>
    %c0_3 = arith.constant 0 : index
    %c0_4 = arith.constant 0 : index
    %4 = vector.load %arg4[%c0_3, %c0_4] : memref<8x1xf32, #tpu.memory_space<vmem>>, vector<8x1xf32>
    %5 = vector.broadcast %4 : vector<8x1xf32> to vector<8x128xf32>
    %6 = arith.addf %3, %5 : vector<8x128xf32>
    %c0_5 = arith.constant 0 : index
    %c0_6 = arith.constant 0 : index
    %7 = vector.load %arg5[%c0_5, %c0_6] : memref<8x128xf32, #tpu.memory_space<vmem>>, vector<8x128xf32>
    tpu.vector_store %arg5[%c0_5, %c0_6], %6 {strides = array<i32>} : memref<8x128xf32, #tpu.memory_space<vmem>>, vector<8x128xf32>,
    return
  }
  func.func @transform_0(%arg0: i32, %arg1: i32) -> (i32, i32) {
    %c0_i32 = arith.constant 0 : i32
    return %arg0, %arg1 : i32, i32
  }
  func.func @transform_1(%arg0: i32, %arg1: i32) -> (i32, i32) {
    %c0_i32 = arith.constant 0 : i32
    %c0_i32_0 = arith.constant 0 : i32
    return %arg0, %c0_i32 : i32, i32
  }
  func.func @transform_2(%arg0: i32, %arg1: i32) -> (i32, i32) {
    %c0_i32 = arith.constant 0 : i32
    %c0_i32_0 = arith.constant 0 : i32
    return %arg0, %c0_i32 : i32, i32
  }
  func.func @transform_3(%arg0: i32, %arg1: i32) -> (i32, i32) {
    %c0_i32 = arith.constant 0 : i32
    return %arg0, %arg1 : i32, i32
  }
}

</mosaic_0001>

<bundles_post_ra>
// kernel: tpu_custom_call.1
= control target key start
LH: loop header
LB: loop body
LE: loop exit
PB: predicated region body
PF: predicated region fallthrough
CT: control target
= control target key end

     0   :  { %8 = vsyncpa [#allocation3], 0  ;;  %s655_s0 = inlined_call_operand.vmem [shape: f32[8,256], index: 0, kind: input, shape index: {}]   ;;  %s656_s1 = inlined_call_operand.vmem [shape: f32[8,1], index: 1, kind: input, shape index: {}]   ;;  %s657_s2 = inlined_call_operand.vmem [shape: f32[8,1], index: 2, kind: input, shape index: {}]   ;;  %s658_s3 = inlined_call_operand.hbm [shape: f32[8,256], index: 3, kind: output, shape index: {}]  }
   0x1   :  { %10 = vsyncpa [#allocation3 + $0x1], 0  ;;  %s537_s12 = smov 0   ;;  %s539_s13 = smov 0  }
   0x2   :  { %s541_s14 = smov 0   ;;  %s543_s15 = smov 0  }
   0x3   :  { %s545_s16 = smov 0   ;;  %s547_s17 = smov 0  }
   0x4 LB: > { %s365_s18 = sadd.s32 4294967295, %s513_s17   ;;  %s366_s19 = sadd.s32 4294967294, %s513_s17   ;;  %s513_s17 = sphi %s547_s17, %s16_s17   ;;  %s509_s16 = sphi %s545_s16, %s665_s16   ;;  %s505_s15 = sphi %s543_s15, %s664_s15   ;;  %s501_s14 = sphi %s541_s14, %s663_s14   ;;  %s497_s13 = sphi %s539_s13, %s662_s13   ;;  %s493_s12 = sphi %s537_s12, %s661_s12  }
   0x5   : > { %s25_s20 = sadd.s32 1, %s509_s16  ;;  %s117_s21 = sadd.s32 1, %s501_s14 }
   0x6   : > { %p26_p0 = scmp.ge.s32.totalorder %s25_s20, 2  ;;  %p127_p1 = scmp.ne.s32.totalorder %s501_s14, %s497_s13 }
   0x7   : > { %p128_p2 = scmp.eq.s32.totalorder %s365_s18, 1  ;;  %p133_p3 = scmp.ne.s32.totalorder %s497_s13, %s493_s12 }
   0x8   : > { %s667_s20 = smov (%p26_p0, %s25_s20), 0  ;;  %p134_p5 = scmp.eq.s32.totalorder %s366_s19, 1 }
   0x9   : > { %p577_p4 = por %p128_p2, %p127_p1  ;;  %s113_s23 = ssub.s32 %s509_s16, %s667_s20 }
   0xa   : > { %p371_p6 = scmp.ge.s32.totalorder %s513_s17, 1  ;;  %p115_p7 = scmp.eq.s32.totalorder %s113_s23, 0 }
   0xb   : > { %p584_p8 = por %p134_p5, %p133_p3  ;;  %p177_p9 = scmp.lt.s32.totalorder %s513_s17, 3 }
   0xc   : > { %s590_s25 = scalar_select %p115_p7, %s501_s14, %s117_s21  }
   0xd   : > { %p178_p10 = pnand %p371_p6, %p177_p9 }
   0xe   : > { %v229_v0 = vld [vmem:[%s656_s1] sm:$0xff] (!%p178_p10)  ;;  %v515_v1 = vmov (!%p178_p10), 0   ;;  %p214_p11 = scmp.lt.s32.totalorder (!%p178_p10), %s505_s15, 1  ;;  %s209_s4 = sand.u32 (!%p178_p10), 1, %s497_s13  }
   0xf   : > { %181 = sbr.rel (%p178_p10) target bundleno = 164 (0xa4), region = 32  ;;  %434 = vset.pattern.permute.xlu0 (!%p178_p10), %v515_v1  ;;  %v236_v2 = vld [vmem:[%s657_s2] sm:$0xff] (!%p178_p10)  ;;  %s372_s6 = sshll.u32 (!%p178_p10), %s209_s4, 3 }
  0x10   : > { %232 = vperm.xlu0 (!%p178_p10), %434, %v229_v0   ;;  %s375_s10 = sshll.u32 (!%p178_p10), %s505_s15, 7  ;;  %s211_s11 = scalar_lea.vmem (!%p178_p10), [#allocation2], %s372_s6 }
  0x11   : > { %s260_s18 = sshll.u32 (!%p178_p10), %s211_s11, 4  ;;  %s608_s23 = scalar_lea.hbm (!%p178_p10), %s658_s3, %s375_s10  ;;  %s610_s18 = int_to_ptr.vmem [resolvable:$true] %s260_s18 }
  0x12   : > { %s245_s26 = scalar_lea.sflag (!%p178_p10), [#allocation3], %s209_s4  ;;  %s435_s27 = scalar_lea.vmem (!%p178_p10), %s610_s18, 128 }
  0x13   : > { %p436_p12 = scmp.ne.s32.totalorder (!%p178_p10), %s610_s18, %s435_s27 }
  0x14   : > { %239 = vperm.xlu0 (!%p178_p10), %434, %v236_v2  }
  0x15   : > { %p437_p13 = pnand (!%p178_p10), %p436_p12, %p577_p4 }
  0x16   : > { %s215_s30 = scalar_select %p214_p11, %s505_s15, 1 }
  0x17   : > { %p438_p0 = pneg %p437_p13  ;;  %s516_s15 = smov [#allocation2]  }
  0x18   : > { %s373_s5 = sshll.u32 %s215_s30, 3  ;;  %s439_s28 = sshll.u32 %s516_s15, 4  ;;  %s440_s28 = int_to_ptr.vmem [resolvable:$false] %s439_s28 }
  0x19   : > { %s219_s9 = scalar_lea.vmem %s655_s0, %s373_s5  ;;  %s441_s29 = scalar_lea.vmem %s440_s28, 256 }
  0x1a   : > { %v228_v4 = vld [vmem:[%s219_s9] sm:$0xff]  ;;  %p442_p1 = scmp.lt.s32.totalorder %s610_s18, %s440_s28  ;;  %p443_p2 = scmp.lt.s32.totalorder %s441_s29, %s435_s27 }
  0x1c   : > { %p444_p3 = por %p443_p2, %p442_p1 }
  0x1e   : > { %p445_p5 = pnand %p444_p3, %p438_p0 }
  0x8f   : > { %v233_v3 = vpop.permute.xlu0 %232 }
  0x90   : > { %v235_v5 = vmul.f32 %v233_v3, %v228_v4 }
  0x93   : > { %v240_v6 = vpop.permute.xlu0 %239 }
  0x94   : > { %v242_v7 = vadd.f32 %v240_v6, %v235_v5 }
  0x96   : > { %243 = vst [vmem:[%s211_s11] sm:$0xff] %v242_v7 }
  0x97   : > { %448 = shalt.err (!%p445_p5)
}
  0x98   : > { %s449_s30 = scalar_lea.hbm %s608_s23, 128  ;;  %s453_s6 = scalar_lea.hbm %s658_s3, 256 }
  0x99   : > { %p450_p6 = scmp.ne.s32.totalorder %s608_s23, %s449_s30  ;;  %p454_p10 = scmp.lt.u32.totalorder %s608_s23, %s658_s3 }
  0x9a   : > { %p455_p11 = scmp.lt.u32.totalorder %s453_s6, %s449_s30  ;;  %p457_p13 = scmp.lt.u32.totalorder %s449_s30, %s608_s23 }
  0x9b   : > { %p451_p7 = pnand %p450_p6, %p577_p4 }
  0x9c   : > { %p456_p12 = por %p455_p11, %p454_p10 }
  0x9d   : > { %p452_p9 = pneg %p451_p7 }
  0x9e   : > { %p458_p0 = por %p457_p13, %p456_p12 }
  0xa0   : > { %p459_p1 = pnand %p458_p0, %p452_p9 }
  0xa2   : > { %462 = shalt.err (!%p459_p1)
}
  0xa3   : > { %378 = dma.vmem_to_hbm [thread:$0]  (%p577_p4), %s610_s18, 128, %s608_s23, %s245_s26  }
  0xa4 PF: > { %p384_p2 = scmp.ge.s32.totalorder %s513_s17, 2  ;;  %s272_s9 = sand.u32 1, %s493_s12  }
  0xa5   : > { %s273_s10 = scalar_lea.sflag [#allocation3], %s272_s9 }
  0xa6   : > { %p381_p3 = pnand %p384_p2, %p584_p8 }
  0xa8   : > { %488 = dma.done.wait (!%p381_p3), %s273_s10, 128  }
  0xa9   : > { %490 = vsyncadd (!%p381_p3), %s273_s10, 4294967168  ;;  %s16_s17 = sadd.s32 1, %s513_s17   ;;  %s661_s12 = smov %s497_s13 }
  0xaa   : > { %p13_p5 = scmp.ge.s32.totalorder %s16_s17, 4   ;;  %s662_s13 = smov %s501_s14 }
  0xab   : > { %s663_s14 = smov %s590_s25  ;;  %s664_s15 = smov %s509_s16 }
  0xac   : > { %s665_s16 = smov %s667_s20  ;;  %15 = sbr.rel (!%p13_p5) target bundleno = 4 (0x4), region = 73 }
  0xb3   :  { %278 = vsyncpa [#allocation3], 1 }
  0xb4   :  { %280 = vsyncpa [#allocation3 + $0x1], 1 }

</bundles_post_ra>
